<compile_context>
chip_gen: v6e
topology: v6e:2x2x1
jax: 0.10.0
libtpu: 0.0.40
codegen_flags: <defaults>
</compile_context>

<pallas_src>
import functools

import jax
import jax.numpy as jnp
from jax.experimental import pallas as pl
from jax.experimental.pallas import tpu as pltpu


def _round_up(x, m):
    return (x + m - 1) // m * m


def _actor_kernel(x_ref, w1_ref, b1_ref, w2_ref, b2_ref, w3_ref, b3_ref, o_ref):
    """Fused 3-layer MLP on one batch tile.

    x_ref:  [TILE_M, state_size] f32 (cast to bf16 in VMEM)
    w*_ref: bf16 weights [in, out];  b*_ref: f32 biases [1, out]
    o_ref:  [TILE_M, a_pad] f32, a_pad = round_up(action_size, 8)
    """
    x = x_ref[...].astype(jnp.bfloat16)

    h = jnp.dot(x, w1_ref[...], preferred_element_type=jnp.float32)
    h = jnp.maximum(h + b1_ref[...], 0.0)

    h = jnp.dot(h.astype(jnp.bfloat16), w2_ref[...],
                preferred_element_type=jnp.float32)
    h = jnp.maximum(h + b2_ref[...], 0.0)

    out = jnp.dot(h.astype(jnp.bfloat16), w3_ref[...],
                  preferred_element_type=jnp.float32)
    o_ref[...] = jnp.tanh(out + b3_ref[...])


def prepare_actor_params(params, action_size):
    """One-time conversion of f32 [in,out]/[out] params into kernel layout.

    Returns (W1 bf16, b1 f32[1,h1], W2 bf16, b2 f32[1,h2],
             W3 bf16 padded to [h2, round_up(action,8)], b3 f32 padded).
    Call this once outside the training/inference hot loop.
    """
    w1, b1, w2, b2, w3, b3 = params
    a_pad = _round_up(action_size, 8)

    w1_p = w1.astype(jnp.bfloat16)
    w2_p = w2.astype(jnp.bfloat16)
    w3_p = (jnp.zeros((w3.shape[0], a_pad), jnp.bfloat16)
            .at[:, :action_size].set(w3.astype(jnp.bfloat16)))
    b1_p = jnp.asarray(b1, jnp.float32).reshape(1, -1)
    b2_p = jnp.asarray(b2, jnp.float32).reshape(1, -1)
    b3_p = (jnp.zeros((1, a_pad), jnp.float32)
            .at[:, :action_size].set(jnp.asarray(b3, jnp.float32).reshape(1, -1)))
    return (w1_p, b1_p, w2_p, b2_p, w3_p, b3_p)


@functools.partial(jax.jit, static_argnames=("action_size", "tile_m"))
def actor_forward(state, prepared_params, *, action_size, tile_m=512):
    """state: [n, num_agents, state_size] -> [n, num_agents, action_size]."""
    n, num_agents, state_size = state.shape
    m = n * num_agents
    x = state.reshape(m, state_size).astype(jnp.float32)

    w1, b1, w2, b2, w3, b3 = prepared_params
    a_pad = w3.shape[1]

    # Balanced batch tiling: >= 2 grid steps (v7x dual-TC sharding), tile is a
    # multiple of 8 sublanes, and padded rows are capped at < 8 per tile.
    tile_m = max(8, tile_m)
    num_tiles = max(2, pl.cdiv(m, tile_m))
    tile = _round_up(pl.cdiv(m, num_tiles), 8)
    m_pad = tile * num_tiles

    if m_pad != m:
        # Explicit row padding so the last tile never reads undefined rows.
        x = jnp.zeros((m_pad, state_size), jnp.float32).at[:m, :].set(x)

    resident = lambda i: (0, 0)  # weights/biases stay pinned across the grid

    out = pl.pallas_call(
        _actor_kernel,
        out_shape=jax.ShapeDtypeStruct((m_pad, a_pad), jnp.float32),
        grid=(num_tiles,),
        in_specs=[
            pl.BlockSpec((tile, state_size), lambda i: (i, 0)),  # x tile
            pl.BlockSpec(w1.shape, resident),                    # W1
            pl.BlockSpec(b1.shape, resident),                    # b1
            pl.BlockSpec(w2.shape, resident),                    # W2
            pl.BlockSpec(b2.shape, resident),                    # b2
            pl.BlockSpec(w3.shape, resident),                    # W3 (8-col pad)
            pl.BlockSpec(b3.shape, resident),                    # b3 (8-col pad)
        ],
        out_specs=pl.BlockSpec((tile, a_pad), lambda i: (i, 0)),
        compiler_params=pltpu.CompilerParams(
            dimension_semantics=("parallel",)),
    )(x, w1, b1, w2, b2, w3, b3)

    return out[:m, :action_size].reshape(n, num_agents, action_size)


def init_actor_params(key, state_size, action_size, hidden_layers=(256, 128)):
    """PyTorch-style nn.Linear init: U(-1/sqrt(fan_in), 1/sqrt(fan_in)).

    Weights are stored [in, out] (transposed vs. PyTorch) so the kernel uses a
    plain row-major matmul; biases are [1, out] for 2-D broadcasting.
    """
    dims = [state_size] + list(hidden_layers) + [action_size]
    params = []
    for fan_in, fan_out in zip(dims[:-1], dims[1:]):
        key, kw, kb = jax.random.split(key, 3)
        bound = 1.0 / jnp.sqrt(jnp.float32(fan_in))
        w = jax.random.uniform(kw, (fan_in, fan_out), jnp.float32, -bound, bound)
        b = jax.random.uniform(kb, (1, fan_out), jnp.float32, -bound, bound)
        params += [w, b]
    return tuple(params)


def actor_forward_ref(state, params):
    """Plain-JAX f32 reference for correctness checking."""
    w1, b1, w2, b2, w3, b3 = params
    x = state.astype(jnp.float32)
    h = jax.nn.relu(x @ w1 + b1)
    h = jax.nn.relu(h @ w2 + b2)
    return jnp.tanh(h @ w3 + b3)


if __name__ == "__main__":
    state_size, action_size = 24, 2
    hidden_layers = (256, 128)

    key = jax.random.PRNGKey(0)
    key_params, key_s1, key_s2 = jax.random.split(key, 3)
    params = init_actor_params(key_params, state_size, action_size, hidden_layers)

    # One-time conversion into kernel layout (bf16, padded W3/b3).
    kparams = prepare_actor_params(params, action_size)

    # Small case consistent with the module's forward contract.
    n, num_agents = 2, 2
    state = jax.random.normal(key_s1, (n, num_agents, state_size), jnp.float32)
    out = jax.block_until_ready(
        actor_forward(state, kparams, action_size=action_size))
    ref = actor_forward_ref(state, params)
    assert out.shape == (n, num_agents, action_size)
    assert jnp.all(jnp.abs(out) <= 1.0)
    # bf16 matmul operands -> looser tolerance than a pure-f32 path.
    assert jnp.allclose(out, ref, atol=2e-2, rtol=2e-2)

    # Multi-tile case: exercises balanced batch tiling (2 x 304 rows for m=600)
    # and row-padding of the final tile.
    n2, num_agents2 = 300, 2
    state2 = jax.random.normal(key_s2, (n2, num_agents2, state_size), jnp.float32)
    out2 = jax.block_until_ready(
        actor_forward(state2, kparams, action_size=action_size))
    ref2 = actor_forward_ref(state2, params)
    assert out2.shape == (n2, num_agents2, action_size)
    assert jnp.all(jnp.abs(out2) <= 1.0)
    assert jnp.allclose(out2, ref2, atol=2e-2, rtol=2e-2)

    print("KERNEL_OK")
</pallas_src>

<mosaic_0001>
module attributes {stable_mosaic.version = 11 : i64} {
  func.func @_actor_kernel(%arg0: i32, %arg1: memref<8x24xf32, #tpu.memory_space<vmem>>, %arg2: memref<24x256xbf16, #tpu.memory_space<vmem>>, %arg3: memref<1x256xf32, #tpu.memory_space<vmem>>, %arg4: memref<256x128xbf16, #tpu.memory_space<vmem>>, %arg5: memref<1x128xf32, #tpu.memory_space<vmem>>, %arg6: memref<128x8xbf16, #tpu.memory_space<vmem>>, %arg7: memref<1x8xf32, #tpu.memory_space<vmem>>, %arg8: memref<8x8xf32, #tpu.memory_space<vmem>>) attributes {dimension_semantics = [#tpu.dimension_semantics<parallel>], iteration_bounds = array<i64: 2>, scalar_prefetch = 0 : i64, scratch_operands = 0 : i64, tpu.core_type = #tpu.core_type<tc>, window_params = [{transform_indices = @transform_0, window_bounds = array<i64: 8, 24>}, {pipeline_mode = #tpu.pipeline_mode<synchronous>, transform_indices = @transform_1, window_bounds = array<i64: 24, 256>}, {pipeline_mode = #tpu.pipeline_mode<synchronous>, transform_indices = @transform_2, window_bounds = array<i64: 1, 256>}, {pipeline_mode = #tpu.pipeline_mode<synchronous>, transform_indices = @transform_3, window_bounds = array<i64: 256, 128>}, {pipeline_mode = #tpu.pipeline_mode<synchronous>, transform_indices = @transform_4, window_bounds = array<i64: 1, 128>}, {pipeline_mode = #tpu.pipeline_mode<synchronous>, transform_indices = @transform_5, window_bounds = array<i64: 128, 8>}, {pipeline_mode = #tpu.pipeline_mode<synchronous>, transform_indices = @transform_6, window_bounds = array<i64: 1, 8>}, {transform_indices = @transform_7, window_bounds = array<i64: 8, 8>}]} {
    %c0 = arith.constant 0 : index
    %c0_0 = arith.constant 0 : index
    %0 = vector.load %arg1[%c0, %c0_0] : memref<8x24xf32, #tpu.memory_space<vmem>>, vector<8x24xf32>
    %1 = arith.truncf %0 : vector<8x24xf32> to vector<8x24xbf16>
    %c0_1 = arith.constant 0 : index
    %c0_2 = arith.constant 0 : index
    %2 = vector.load %arg2[%c0_1, %c0_2] : memref<24x256xbf16, #tpu.memory_space<vmem>>, vector<24x256xbf16>
    %cst = arith.constant dense<0.000000e+00> : vector<8x256xf32>
    %3 = tpu.matmul %1, %2, %cst {dimension_numbers = #tpu.dot_dimension_numbers<[1], [0], [0], [1], [0, 0, 1, 1], [], []>} : vector<8x24xbf16>, vector<24x256xbf16>, vector<8x256xf32> -> vector<8x256xf32>
    %c0_3 = arith.constant 0 : index
    %c0_4 = arith.constant 0 : index
    %4 = vector.load %arg3[%c0_3, %c0_4] : memref<1x256xf32, #tpu.memory_space<vmem>>, vector<1x256xf32>
    %5 = vector.broadcast %4 : vector<1x256xf32> to vector<8x256xf32>
    %6 = arith.addf %3, %5 : vector<8x256xf32>
    %cst_5 = arith.constant 0.000000e+00 : f32
    %7 = vector.broadcast %cst_5 : f32 to vector<8x256xf32>
    %8 = arith.maximumf %6, %7 : vector<8x256xf32>
    %9 = arith.truncf %8 : vector<8x256xf32> to vector<8x256xbf16>
    %c0_6 = arith.constant 0 : index
    %c0_7 = arith.constant 0 : index
    %10 = vector.load %arg4[%c0_6, %c0_7] : memref<256x128xbf16, #tpu.memory_space<vmem>>, vector<256x128xbf16>
    %cst_8 = arith.constant dense<0.000000e+00> : vector<8x128xf32>
    %11 = tpu.matmul %9, %10, %cst_8 {dimension_numbers = #tpu.dot_dimension_numbers<[1], [0], [0], [1], [0, 0, 1, 1], [], []>} : vector<8x256xbf16>, vector<256x128xbf16>, vector<8x128xf32> -> vector<8x128xf32>
    %c0_9 = arith.constant 0 : index
    %c0_10 = arith.constant 0 : index
    %12 = vector.load %arg5[%c0_9, %c0_10] : memref<1x128xf32, #tpu.memory_space<vmem>>, vector<1x128xf32>
    %13 = vector.broadcast %12 : vector<1x128xf32> to vector<8x128xf32>
    %14 = arith.addf %11, %13 : vector<8x128xf32>
    %cst_11 = arith.constant 0.000000e+00 : f32
    %15 = vector.broadcast %cst_11 : f32 to vector<8x128xf32>
    %16 = arith.maximumf %14, %15 : vector<8x128xf32>
    %17 = arith.truncf %16 : vector<8x128xf32> to vector<8x128xbf16>
    %c0_12 = arith.constant 0 : index
    %c0_13 = arith.constant 0 : index
    %18 = vector.load %arg6[%c0_12, %c0_13] : memref<128x8xbf16, #tpu.memory_space<vmem>>, vector<128x8xbf16>
    %cst_14 = arith.constant dense<0.000000e+00> : vector<8x8xf32>
    %19 = tpu.matmul %17, %18, %cst_14 {dimension_numbers = #tpu.dot_dimension_numbers<[1], [0], [0], [1], [0, 0, 1, 1], [], []>} : vector<8x128xbf16>, vector<128x8xbf16>, vector<8x8xf32> -> vector<8x8xf32>
    %c0_15 = arith.constant 0 : index
    %c0_16 = arith.constant 0 : index
    %20 = vector.load %arg7[%c0_15, %c0_16] : memref<1x8xf32, #tpu.memory_space<vmem>>, vector<1x8xf32>
    %21 = vector.broadcast %20 : vector<1x8xf32> to vector<8x8xf32>
    %22 = arith.addf %19, %21 : vector<8x8xf32>
    %23 = math.tanh %22 : vector<8x8xf32>
    %c0_17 = arith.constant 0 : index
    %c0_18 = arith.constant 0 : index
    %24 = vector.load %arg8[%c0_17, %c0_18] : memref<8x8xf32, #tpu.memory_space<vmem>>, vector<8x8xf32>
    tpu.vector_store %arg8[%c0_17, %c0_18], %23 {strides = array<i32>} : memref<8x8xf32, #tpu.memory_space<vmem>>, vector<8x8xf32>,
    return
  }
  func.func @transform_0(%arg0: i32) -> (i32, i32) {
    %c0_i32 = arith.constant 0 : i32
    %c0_i32_0 = arith.constant 0 : i32
    return %arg0, %c0_i32 : i32, i32
  }
  func.func @transform_1(%arg0: i32) -> (i32, i32) {
    %c0_i32 = arith.constant 0 : i32
    %c0_i32_0 = arith.constant 0 : i32
    %c0_i32_1 = arith.constant 0 : i32
    return %c0_i32, %c0_i32_0 : i32, i32
  }
  func.func @transform_2(%arg0: i32) -> (i32, i32) {
    %c0_i32 = arith.constant 0 : i32
    %c0_i32_0 = arith.constant 0 : i32
    %c0_i32_1 = arith.constant 0 : i32
    return %c0_i32, %c0_i32_0 : i32, i32
  }
  func.func @transform_3(%arg0: i32) -> (i32, i32) {
    %c0_i32 = arith.constant 0 : i32
    %c0_i32_0 = arith.constant 0 : i32
    %c0_i32_1 = arith.constant 0 : i32
    return %c0_i32, %c0_i32_0 : i32, i32
  }
  func.func @transform_4(%arg0: i32) -> (i32, i32) {
    %c0_i32 = arith.constant 0 : i32
    %c0_i32_0 = arith.constant 0 : i32
    %c0_i32_1 = arith.constant 0 : i32
    return %c0_i32, %c0_i32_0 : i32, i32
  }
  func.func @transform_5(%arg0: i32) -> (i32, i32) {
    %c0_i32 = arith.constant 0 : i32
    %c0_i32_0 = arith.constant 0 : i32
    %c0_i32_1 = arith.constant 0 : i32
    return %c0_i32, %c0_i32_0 : i32, i32
  }
  func.func @transform_6(%arg0: i32) -> (i32, i32) {
    %c0_i32 = arith.constant 0 : i32
    %c0_i32_0 = arith.constant 0 : i32
    %c0_i32_1 = arith.constant 0 : i32
    return %c0_i32, %c0_i32_0 : i32, i32
  }
  func.func @transform_7(%arg0: i32) -> (i32, i32) {
    %c0_i32 = arith.constant 0 : i32
    %c0_i32_0 = arith.constant 0 : i32
    return %arg0, %c0_i32 : i32, i32
  }
}

</mosaic_0001>

<bundles_post_ra>
// kernel: actor_forward.1
= control target key start
LH: loop header
LB: loop body
LE: loop exit
PB: predicated region body
PF: predicated region fallthrough
CT: control target
= control target key end

     0   :  { %12 = vsyncpa [#allocation3], 0  ;;  %s967_s24 = smov 0   ;;  %s1047_s0 = inlined_call_operand.vmem [shape: f32[16,24], index: 0, kind: input, shape index: {}]   ;;  %s1048_s1 = inlined_call_operand.vmem [shape: bf16[24,256], index: 1, kind: input, shape index: {}]   ;;  %s1049_s2 = inlined_call_operand.vmem [shape: f32[1,256], index: 2, kind: input, shape index: {}]   ;;  %s1050_s3 = inlined_call_operand.hbm [shape: bf16[256,128], index: 3, kind: input, shape index: {}]   ;;  %s1051_s4 = inlined_call_operand.vmem [shape: f32[1,128], index: 4, kind: input, shape index: {}]   ;;  %s1052_s5 = inlined_call_operand.vmem [shape: bf16[128,8], index: 5, kind: input, shape index: {}]   ;;  %s1053_s6 = inlined_call_operand.vmem [shape: f32[1,8], index: 6, kind: input, shape index: {}]   ;;  %s1054_s7 = inlined_call_operand.vmem [shape: f32[16,8], index: 7, kind: output, shape index: {}]  }
   0x1 LB: > { %s734_s25 = sadd.s32 4294967295, %s919_s24   ;;  %p736_p0 = scmp.ge.s32.totalorder %s919_s24, 1  ;;  %s919_s24 = sphi %s967_s24, %s18_s24  }
   0x2   : > { %p201_p1 = scmp.lt.s32.totalorder %s919_s24, 3  ;;  %s921_s26 = smov [#allocation2]  }
   0x3   : > { %s219_s27 = sshll.u32 %s921_s26, 4  ;;  %p836_p3 = scmp.eq.s32.totalorder %s734_s25, 0  ;;  %s220_s27 = int_to_ptr.vmem [resolvable:$true] %s219_s27 }
   0x4   : > { %p975_p2 = pnand %p736_p0, %p201_p1  ;;  %s894_s29 = scalar_lea.vmem %s220_s27, 2048 }
   0x5   : > { %p895_p7 = scmp.ne.s32.totalorder %s220_s27, %s894_s29  ;;  %p902_p10 = scmp.lt.s32.totalorder %s220_s27, %s220_s27 }
   0x6   : > { %p832_p4 = pneg %p975_p2  ;;  %p903_p11 = scmp.lt.s32.totalorder %s894_s29, %s894_s29 }
   0x8   : > { %p833_p5 = pnand %p836_p3, %p832_p4  ;;  %p904_p12 = por %p903_p11, %p902_p10 }
   0xa   : > { %p885_p6 = pneg %p833_p5 }
   0xc   : > { %p897_p8 = pnand %p895_p7, %p885_p6 }
   0xe   : > { %p898_p9 = pneg %p897_p8 }
  0x10   : > { %p905_p13 = pnand %p904_p12, %p898_p9 }
  0x12   : > { %908 = shalt.err (!%p905_p13)
}
  0x13   : > { %s922_s30 = smov 64   ;;  %s923_s8 = smov 4  }
  0x14   : > { %835 = dma.hbm_to_vmem [thread:$0]  (!%p833_p5), %s1050_s3, 2048, %s220_s27, [#allocation3], %s922_s30, %s922_s30, %s923_s8  }
  0x15   : > { %251 = sbr.rel (%p975_p2) target bundleno = 653 (0x28d), region = 48 }
  0x1a   : > { %914 = dma.done.wait (%p836_p3), [#allocation3], 2048  }
  0x1b   : > { %916 = vsyncadd (%p836_p3), [#allocation3], 4294965248  ;;  %p281_p0 = scmp.lt.s32.totalorder %s734_s25, 1  ;;  %v924_v0 = vmov 0   ;;  %v294_v1 = vld [vmem:[%s1048_s1 + $0x10] sm:$0xff]  ;;  %vm326_vm0 = vcmask 1043456   ;;  %v297_v31 = vlaneseq }
  0x1c   : > { %365 = vmatprep.mubr.bf16.mxu0 %v924_v0  ;;  %v746_v2 = vcombine.high %v294_v1, %v294_v1  ;;  %v745_v3 = vcombine.low %v294_v1, %v294_v1  ;;  %v854_v4 = vld [vmem:[%s1048_s1 + $0x4] ss:$8 sps:$4 sm:$0xff]   ;;  %v856_v5 = vld [vmem:[%s1048_s1] ss:$8 sps:$4 sm:$0xff]   ;;  %v857_v7 = vld [vmem:[#allocation2 + $0x78] sm:$0xff]   ;;  %vm322_vm1 = vcmask 195584  }
  0x1d   : > { %s1057_s25 = smov (!%p281_p0, %s734_s25), 1  ;;  %v858_v9 = vld [vmem:[#allocation2 + $0x38] sm:$0xff]   ;;  %777 = vmatprep.subr.bf16.mxu1 %v857_v7  ;;  %v859_v10 = vld [vmem:[#allocation2 + $0x70] sm:$0xff]   ;;  %v861_v12 = vld [vmem:[#allocation2 + $0x68] sm:$0xff]   ;;  %v925_v26 = vmov 0.0   ;;  %v298_v32 = vshrl.u32 %v297_v31, 7 }
  0x1e   : > { %s741_s11 = sshll.u32 %s1057_s25, 3  ;;  %747 = vmatprep.subr.msk.bf16.mxu0 %vm326_vm0, %v746_v2  ;;  %v328_v8 = vsel %vm326_vm0, %v745_v3, 0  ;;  %778 = vmatpush3.bf16.msra.mxu1 %v858_v9  ;;  %v860_v11 = vld [vmem:[#allocation2 + $0x30] sm:$0xff]   ;;  %v862_v14 = vld [vmem:[#allocation2 + $0x28] sm:$0xff]   ;;  %v863_v15 = vld [vmem:[#allocation2 + $0x60] sm:$0xff]   ;;  %vm926_vm2 = vmmov 0  }
  0x1f   : > { %s284_s14 = scalar_lea.vmem %s1047_s0, %s741_s11  ;;  %346 = vmatpush1.bf16.msra.mxu0 %v328_v8  ;;  %779 = vmatprep.subr.bf16.mxu1 %v859_v10  ;;  %v864_v16 = vld [vmem:[#allocation2 + $0x20] sm:$0xff]   ;;  %v865_v17 = vld [vmem:[#allocation2 + $0x58] sm:$0xff]   ;;  %v867_v19 = vld [vmem:[#allocation2 + $0x50] sm:$0xff]   ;;  %v299_v33 = vsub.s32 0, %v298_v32  ;;  %v303_v35 = vsub.s32 1, %v298_v32  ;;  %s288_s27 = scalar_lea.vmem %s1054_s7, %s741_s11  ;;  %vm667_vm3 = vcmask 64512  }
  0x20   : > { %v290_v6 = vld [vmem:[%s284_s14] sm:$0xff]  ;;  %347 = vmatprep.subr.bf16.mxu0 %v854_v4  ;;  %v866_v18 = vld [vmem:[#allocation2 + $0x18] sm:$0xff]   ;;  %v868_v20 = vld [vmem:[#allocation2 + $0x10] sm:$0xff]  }
  0x21   : > { %v291_v13 = vpack.c.bf16 %v290_v6, %v290_v6  ;;  %v869_v21 = vld [vmem:[#allocation2 + $0x48] sm:$0xff]   ;;  %v871_v23 = vld [vmem:[#allocation2 + $0x40] sm:$0xff]   ;;  %v873_v25 = vld [vmem:[%s1052_s5 + $0x38] sm:$0xff]  }
  0x22   : > { %780 = vmatpush3.bf16.msra.mxu1 %v860_v11  ;;  %v870_v22 = vld [vmem:[#allocation2 + $0x8] sm:$0xff]   ;;  %v872_v24 = vld [vmem:[#allocation2] sm:$0xff]   ;;  %v874_v27 = vld [vmem:[%s1052_s5 + $0x30] sm:$0xff]  }
  0x23   : > { %348 = vmatpush1.bf16.msra.mxu0 %v856_v5  ;;  %781 = vmatprep.subr.bf16.mxu1 %v861_v12  ;;  %v875_v28 = vld [vmem:[%s1052_s5 + $0x28] sm:$0xff]   ;;  %v876_v29 = vld [vmem:[%s1052_s5 + $0x20] sm:$0xff]   ;;  %v877_v30 = vld [vmem:[%s1052_s5 + $0x18] sm:$0xff]  }
  0x24   : > { %808 = vmatprep.subr.bf16.mxu0 %v925_v26  ;;  %v295_v34 = vld [vmem:[%s1049_s2] sm:$0x3]  ;;  %v878_v48 = vld [vmem:[%s1052_s5 + $0x10] sm:$0xff]   ;;  %v879_v49 = vld [vmem:[%s1052_s5 + $0x8] sm:$0xff]  }
  0x25   : > { %v300_v36 = vrot.slane %v295_v34, %v299_v33  ;;  %v304_v37 = vrot.slane %v295_v34, %v303_v35  ;;  %v880_v50 = vld [vmem:[%s1052_s5] sm:$0xff]  }
  0x26   : > { %748 = vmatmul.mubr.msk.bf16.vlgmr.msra.gmra.mxu0 %vm322_vm1, %v291_v13  ;;  %782 = vmatpush3.bf16.msra.mxu1 %v862_v14  ;;  %v749_v52 = vld [vmem:[%s1051_s4] ss:$0 sm:$0xff] }
  0x27   : > { %783 = vmatprep.subr.bf16.mxu1 %v863_v15  ;;  %809 = vmatpush3.bf16.msra.mxu0 %v873_v25  ;;  %v766_v60 = vld [vmem:[%s1053_s6] ss:$0 sm:$0xff] }
  0x28   : > { %810 = vmatprep.subr.bf16.mxu0 %v925_v26  ;;  %824 = vmatprep.mubr.msk.bf16.mxu0 %vm926_vm2, %v925_v26 }
  0x2a   : > { %784 = vmatpush3.bf16.msra.mxu1 %v864_v16 }
  0x2b   : > { %785 = vmatprep.subr.bf16.mxu1 %v865_v17  ;;  %811 = vmatpush3.bf16.msra.mxu0 %v874_v27 }
  0x2c   : > { %812 = vmatprep.subr.bf16.mxu0 %v925_v26 }
  0x2e   : > { %786 = vmatpush3.bf16.msra.mxu1 %v866_v18 }
  0x2f   : > { %787 = vmatprep.subr.bf16.mxu1 %v867_v19  ;;  %813 = vmatpush3.bf16.msra.mxu0 %v875_v28 }
  0x30   : > { %814 = vmatprep.subr.bf16.mxu0 %v925_v26 }
  0x32   : > { %788 = vmatpush3.bf16.msra.mxu1 %v868_v20 }
  0x33   : > { %789 = vmatprep.subr.bf16.mxu1 %v869_v21  ;;  %815 = vmatpush3.bf16.msra.mxu0 %v876_v29 }
  0x34   : > { %816 = vmatprep.subr.bf16.mxu0 %v925_v26 }
  0x36   : > { %790 = vmatpush3.bf16.msra.mxu1 %v870_v22 }
  0x37   : > { %791 = vmatprep.subr.bf16.mxu1 %v871_v23  ;;  %817 = vmatpush3.bf16.msra.mxu0 %v877_v30 }
  0x38   : > { %818 = vmatprep.subr.bf16.mxu0 %v925_v26 }
  0x3a   : > { %792 = vmatpush3.bf16.msra.mxu1 %v872_v24 }
  0x3b   : > { %819 = vmatpush3.bf16.msra.mxu0 %v878_v48 }
  0x3c   : > { %820 = vmatprep.subr.bf16.mxu0 %v925_v26 }
  0x3f   : > { %821 = vmatpush3.bf16.msra.mxu0 %v879_v49 }
  0x40   : > { %822 = vmatprep.subr.bf16.mxu0 %v925_v26 }
  0x43   : > { %823 = vmatpush3.bf16.msra.mxu0 %v880_v50 }
  0xe6   : > { %v367_v38 = vpop.f32.mrf.mxu0 }
  0xe7   : > { %v368_v39 = vadd.f32 %v367_v38, %v300_v36 }
  0xe8   : > { %v369_v40 = vpop.f32.mrf.mxu0 }
  0xe9   : > { %v370_v41 = vadd.f32 %v369_v40, %v304_v37  ;;  %v374_v42 = vmax.f32 %v368_v39, 0.0 }
  0xea   : > { %v371_v43 = vpop.f32.mrf.mxu0 }
  0xeb   : > { %v375_v44 = vmax.f32 %v370_v41, 0.0  ;;  %v376_v47 = vpack.c.bf16 %v374_v42, %v374_v42 }
  0xec   : > { %v372_v45 = vpop.f32.mrf.mxu0 }
  0xed   : > { %v377_v46 = vpack.c.bf16 %v375_v44, %v375_v44 }
  0xef   : > { %545 = vmatprep.mubr.bf16.mxu1 %v377_v46 }
  0xf0   : > { %546 = vmatmul.mubr.bf16.vlgmr.msra.gmra.mxu1 %v376_v47 }
 0x1b0   : > { %v793_v51 = vpop.f32.mrf.mxu1 }
 0x1b2   : > { %v794_v53 = vpop.f32.mrf.mxu1 }
 0x1b3   : > { %v795_v54 = vadd.f32 %v794_v53, %v793_v51 }
 0x1b4   : > { %v796_v55 = vpop.f32.mrf.mxu1 }
 0x1b5   : > { %v548_v56 = vadd.f32 %v795_v54, %v749_v52 }
 0x1b6   : > { %v797_v57 = vpop.f32.mrf.mxu1 }
 0x1b7   : > { %v553_v58 = vmax.f32 %v548_v56, 0.0 }
 0x1b9   : > { %v554_v59 = vpack.c.bf16 %v553_v58, %v553_v58 }
 0x1bb   : > { %825 = vmatmul.mubr.bf16.vlgmr.msra.gmra.mxu0 %v554_v59 }
 0x27b   : > { %v660_v61 = vpop.f32.mrf.mxu0 }
 0x27c   : > { %v661_v62 = vadd.f32 %v766_v60, %v660_v61 }
 0x27d   : > { %v826_v63 = vpop.f32.mrf.mxu0 }
 0x27e   : > { %881 = vtanh.f32 %v661_v62 }
 0x27f   : > { %v663_v0 = vpop.f32.mrf.mxu0 }
 0x281   : > { %v827_v1 = vpop.f32.mrf.mxu0 }
 0x28b   : > { %v882_v2 = vpop.eup %881 }
 0x28c   : > { %668 = vst.msk [vmem:[%s288_s27] sm:$0xff] %vm667_vm3, %v882_v2 }
 0x28d PF: > { %s18_s24 = sadd.s32 1, %s919_s24  }
 0x28e   : > { %p15_p1 = scmp.ge.s32.totalorder %s18_s24, 4  }
 0x290   :  { %17 = sbr.rel (!%p15_p1) target bundleno = 1 (0x1), region = 83 }
 0x295   :  { %688 = vsyncpa [#allocation3], 1 }
 0x296   :  { %690 = vsyncpa [#allocation3 + $0x1], 1 }

</bundles_post_ra>
